<compile_context>
chip_gen: v7x
topology: tpu7x:2x2x1
jax: 0.10.0
libtpu: 0.0.40
codegen_flags: <defaults>
</compile_context>

<pallas_src>
import functools

import jax
import jax.numpy as jnp
import numpy as np
from jax import lax
from jax.experimental import pallas as pl
from jax.experimental.pallas import tpu as pltpu


def _soft_moe_kernel(h_ref, se_ref, w_ref, b_ref, o_ref,
                     m_sc, l_sc, acc_sc, *, matmul_dtype, approx_recip):
    """One grid step = (one batch block) x (one expert).

    Grid = (B // b_tile, E). The trailing expert axis is a reduction axis: the
    combine softmax over (experts, slots) is accumulated online with running
    max / denominator / numerator in VMEM scratch and normalized at the last
    expert step.
    """
    e_idx = pl.program_id(1)
    last_e = pl.num_programs(1) - 1

    bt, N, D = h_ref.shape
    S = se_ref.shape[-1]
    d_out = w_ref.shape[-1]

    @pl.when(e_idx == 0)
    def _init():
        # -1e30 (not -inf) avoids inf-arithmetic edge cases; exp(-1e30 - x) == 0.
        m_sc[...] = jnp.full(m_sc.shape, -1e30, dtype=m_sc.dtype)
        l_sc[...] = jnp.zeros(l_sc.shape, dtype=l_sc.dtype)
        acc_sc[...] = jnp.zeros(acc_sc.shape, dtype=acc_sc.dtype)

    h3 = h_ref[...]                                    # (bt, N, D)  matmul_dtype
    se_e = se_ref[0]                                   # (D, S)      normalized slot embeds^T
    w_e = w_ref[0]                                     # (D, d_out)  expert weight^T
    bias_e = b_ref[0]                                  # (1, d_out)  f32

    # ---- router logits for this expert (MXU-native: lane of LHS x sublane of RHS)
    h2 = h3.reshape(bt * N, D)
    logits2 = jnp.dot(h2, se_e, preferred_element_type=jnp.float32)    # (bt*N, S)
    logits3 = logits2.reshape(bt, N, S)

    # ---- dispatch softmax over tokens (per (expert, slot) -> tiles trivially
    #      over the expert grid axis). Lane-native reduction after one small
    #      XLU transpose.
    lt = jnp.transpose(logits3, (0, 2, 1))                             # (bt, S, N)
    p0 = jnp.exp(lt - jnp.max(lt, axis=-1, keepdims=True))
    disp_t = p0 * pl.reciprocal(jnp.sum(p0, axis=-1, keepdims=True),
                                approx=approx_recip)                   # (bt, S, N)

    # slots[b, s, d] = sum_n dispatch[b, n, s] * h[b, n, d]
    slots3 = jnp.einsum('bsn,bnd->bsd', disp_t.astype(matmul_dtype), h3,
                        preferred_element_type=jnp.float32)            # (bt, S, D)

    # ---- expert nn.Linear with a fat M-dim: bt*S rows through one weight push.
    slots2 = slots3.reshape(bt * S, D).astype(matmul_dtype)
    outs2 = jnp.dot(slots2, w_e, preferred_element_type=jnp.float32)   # (bt*S, d_out)
    outs3 = (outs2 + bias_e).reshape(bt, S, d_out)

    # ---- online combine softmax over (experts, slots) across the expert axis.
    m_prev = m_sc[...]
    m_new = jnp.maximum(m_prev, jnp.max(logits3, axis=-1, keepdims=True))
    alpha = jnp.exp(m_prev - m_new)                                    # (bt, N, 1)
    p = jnp.exp(logits3 - m_new)                                       # (bt, N, S)
    l_sc[...] = alpha * l_sc[...] + jnp.sum(p, axis=-1, keepdims=True)
    acc_sc[...] = alpha * acc_sc[...] + jnp.einsum(
        'bns,bso->bno', p.astype(matmul_dtype), outs3.astype(matmul_dtype),
        preferred_element_type=jnp.float32)
    m_sc[...] = m_new

    @pl.when(e_idx == last_e)
    def _finalize():
        o_ref[...] = (acc_sc[...] *
                      pl.reciprocal(l_sc[...], approx=approx_recip)
                      ).astype(o_ref.dtype)


def soft_moe(hidden, slot_embeds, rms_weight, expert_w, expert_b, *,
             eps=1e-6, matmul_dtype=jnp.bfloat16, out_dtype=None, b_tile=None):
    """SoftMoE forward (eval). expert_w follows nn.Linear layout (E, D_out, D_in).

    hidden is DMA'd in matmul_dtype (bf16 default) and the output is written in
    out_dtype (defaults to matmul_dtype): halves HBM<->VMEM traffic vs f32 I/O.
    """
    B, N, D = hidden.shape
    E, S, _ = slot_embeds.shape
    d_out = expert_w.shape[1]
    out_dtype = matmul_dtype if out_dtype is None else out_dtype

    # ---- batch-invariant preprocessing (hoisted out of the kernel) ----
    se32 = slot_embeds.astype(jnp.float32)
    ms = jnp.mean(se32 * se32, axis=-1, keepdims=True)
    se_n = se32 * lax.rsqrt(ms + eps) * rms_weight.astype(jnp.float32)
    se_t = jnp.transpose(se_n, (0, 2, 1)).astype(matmul_dtype)          # (E, D, S)
    w_t = jnp.transpose(expert_w, (0, 2, 1)).astype(matmul_dtype)       # (E, D, d_out)
    b = expert_b.astype(jnp.float32).reshape(E, 1, d_out)               # (E, 1, d_out)

    if b_tile is None:
        # Largest divisor of B up to 8: fattens the expert-matmul M-dim
        # (b_tile*S rows) while keeping the per-step block small enough for
        # v7x's tighter VMEM. Raise for realistic B on v6e/v7x.
        b_tile = 1
        for cand in range(1, min(B, 8) + 1):
            if B % cand == 0:
                b_tile = cand
    assert B % b_tile == 0, "b_tile must divide the batch size"

    approx_recip = np.dtype(matmul_dtype) != np.dtype(jnp.float32)

    kernel = functools.partial(_soft_moe_kernel, matmul_dtype=matmul_dtype,
                               approx_recip=approx_recip)

    isz = np.dtype(matmul_dtype).itemsize
    osz = np.dtype(out_dtype).itemsize
    n_b = B // b_tile

    # Advisory cost estimate for the XLA scheduler.
    flops = int(2 * B * E * S * (2 * N * D + D * d_out + N * d_out))
    transcendentals = int(B * E * (2 * N * S + N))
    bytes_accessed = int(B * N * D * isz
                         + n_b * E * ((D * S + D * d_out) * isz + d_out * 4)
                         + B * N * d_out * osz)

    # Scoped-VMEM budget: double-buffered blocks + scratch + intermediates, with
    # 2x slack, capped safely below physical VMEM (v7x: 64 MiB per TensorCore).
    block_bytes = (2 * b_tile * N * D * isz
                   + 2 * (D * S + D * d_out) * isz + 2 * d_out * 4
                   + 2 * b_tile * N * d_out * osz)
    scratch_bytes = 4 * b_tile * N * (2 + d_out)
    interm_bytes = 4 * b_tile * (4 * N * S + 2 * S * (D + d_out) + 2 * N * d_out)
    try:
        phys_vmem = pltpu.get_tpu_info().vmem_capacity_bytes
        vmem_cap = min(int(0.75 * phys_vmem), 100 << 20)
    except Exception:
        vmem_cap = 48 << 20   # conservative fallback: always fits v7x's 64 MiB
    vmem_limit = int(min(max(2 * (block_bytes + scratch_bytes + interm_bytes),
                             32 << 20), vmem_cap))

    return pl.pallas_call(
        kernel,
        out_shape=jax.ShapeDtypeStruct((B, N, d_out), out_dtype),
        grid_spec=pltpu.PrefetchScalarGridSpec(
            num_scalar_prefetch=0,
            # B leading + "parallel" (megacore-shardable); expert axis trailing
            # + "arbitrary" (streamed reduction with online combine softmax).
            grid=(n_b, E),
            in_specs=[
                pl.BlockSpec((b_tile, N, D), lambda b_, e_: (b_, 0, 0)),   # hidden
                pl.BlockSpec((1, D, S), lambda b_, e_: (e_, 0, 0)),        # slot embeds^T
                pl.BlockSpec((1, D, d_out), lambda b_, e_: (e_, 0, 0)),    # expert W^T
                pl.BlockSpec((1, 1, d_out), lambda b_, e_: (e_, 0, 0)),    # expert bias
            ],
            out_specs=pl.BlockSpec((b_tile, N, d_out), lambda b_, e_: (b_, 0, 0)),
            scratch_shapes=[
                pltpu.VMEM((b_tile, N, 1), jnp.float32),      # running max
                pltpu.VMEM((b_tile, N, 1), jnp.float32),      # running denom
                pltpu.VMEM((b_tile, N, d_out), jnp.float32),  # running numerator
            ],
        ),
        compiler_params=pltpu.CompilerParams(
            dimension_semantics=("parallel", "arbitrary"),
            vmem_limit_bytes=vmem_limit,
        ),
        cost_estimate=pl.CostEstimate(flops=flops,
                                      transcendentals=transcendentals,
                                      bytes_accessed=bytes_accessed),
    )(hidden.astype(matmul_dtype), se_t, w_t, b)


def soft_moe_reference(h, se, g, w, b, eps=1e-6):
    """Pure-JAX f32 reference mirroring the PyTorch forward (eval mode).

    HIGHEST matmul precision so the baseline is trustworthy on TPU (XLA's
    DEFAULT f32 dot is a single bf16 pass, which previously broke the check).
    """
    hp = lax.Precision.HIGHEST
    ms = jnp.mean(se * se, axis=-1, keepdims=True)
    sen = se * lax.rsqrt(ms + eps) * g
    logits = jnp.einsum('bnd,esd->bnes', h, sen, precision=hp)

    def sm(x, axes):
        m = jnp.max(x, axis=axes, keepdims=True)
        e = jnp.exp(x - m)
        return e / jnp.sum(e, axis=axes, keepdims=True)

    dispatch = sm(logits, 1)
    combine = sm(logits, (2, 3))
    slots = jnp.einsum('bnd,bnes->besd', h, dispatch, precision=hp)
    outs = jnp.einsum('besd,eod->beso', slots, w, precision=hp) + b[None, :, None, :]
    return jnp.einsum('beso,bnes->bno', outs, combine, precision=hp)


if __name__ == "__main__":
    B, N, D = 2, 8, 32      # batch, tokens, hidden_size
    E, S = 4, 4             # num_experts, num_slots

    key = jax.random.PRNGKey(0)
    k_h, k_se, k_w, k_b = jax.random.split(key, 4)

    hidden = jax.random.normal(k_h, (B, N, D), dtype=jnp.float32)
    # nn.Parameter(torch.rand(...)) -> uniform [0, 1)
    slot_embeds = jax.random.uniform(k_se, (E, S, D), dtype=jnp.float32)
    # RMSNorm weight initialized to ones (standard RMSNorm init).
    rms_weight = jnp.ones((D,), dtype=jnp.float32)
    # Per-expert nn.Linear(D, D) weights/biases (nn.Linear layout: (D_out, D_in)).
    expert_w = jax.random.normal(k_w, (E, D, D), dtype=jnp.float32) * 0.05
    expert_b = jax.random.normal(k_b, (E, D), dtype=jnp.float32) * 0.05

    ref = soft_moe_reference(hidden, slot_embeds, rms_weight, expert_w, expert_b)

    # f32-operand path (exact reciprocals). Tolerance is set to be robust to the
    # hardware's f32-matmul pass decomposition while still catching any
    # structural error (which would be ~100x larger).
    out_f32 = jax.block_until_ready(
        soft_moe(hidden, slot_embeds, rms_weight, expert_w, expert_b,
                 matmul_dtype=jnp.float32, out_dtype=jnp.float32))
    if not jnp.allclose(out_f32, ref, atol=1e-2, rtol=1e-2):
        err = float(jnp.max(jnp.abs(out_f32 - ref)))
        raise AssertionError(
            f"f32 Pallas SoftMoE does not match reference (max abs err {err:.3e})")

    # Default bf16 path: bf16 operands + bf16 output DMA, f32 accumulation.
    out_bf16 = jax.block_until_ready(
        soft_moe(hidden, slot_embeds, rms_weight, expert_w, expert_b))
    if not jnp.allclose(out_bf16.astype(jnp.float32), ref, atol=5e-2, rtol=5e-2):
        err = float(jnp.max(jnp.abs(out_bf16.astype(jnp.float32) - ref)))
        raise AssertionError(
            f"bf16 Pallas SoftMoE does not match reference (max abs err {err:.3e})")

    print("KERNEL_OK")
</pallas_src>

<mosaic_0001>
module attributes {stable_mosaic.version = 11 : i64} {
  func.func @_soft_moe_kernel(%arg0: i32, %arg1: i32, %arg2: memref<2x8x32xf32, #tpu.memory_space<vmem>>, %arg3: memref<1x32x4xf32, #tpu.memory_space<vmem>>, %arg4: memref<1x32x32xf32, #tpu.memory_space<vmem>>, %arg5: memref<1x1x32xf32, #tpu.memory_space<vmem>>, %arg6: memref<2x8x32xf32, #tpu.memory_space<vmem>>, %arg7: memref<2x8x1xf32, #tpu.memory_space<vmem>>, %arg8: memref<2x8x1xf32, #tpu.memory_space<vmem>>, %arg9: memref<2x8x32xf32, #tpu.memory_space<vmem>>) attributes {dimension_semantics = [#tpu.dimension_semantics<parallel>, #tpu.dimension_semantics<arbitrary>], iteration_bounds = array<i64: 1, 4>, scalar_prefetch = 0 : i64, scratch_operands = 3 : i64, tpu.core_type = #tpu.core_type<tc>, window_params = [{transform_indices = @transform_0, window_bounds = array<i64: 2, 8, 32>}, {transform_indices = @transform_1, window_bounds = array<i64: 1, 32, 4>}, {transform_indices = @transform_2, window_bounds = array<i64: 1, 32, 32>}, {transform_indices = @transform_3, window_bounds = array<i64: 1, 1, 32>}, {transform_indices = @transform_4, window_bounds = array<i64: 2, 8, 32>}]} {
    %c0_i32 = arith.constant 0 : i32
    %0 = arith.cmpi eq, %arg1, %c0_i32 : i32
    %1 = arith.extui %0 : i1 to i32
    %c0_i32_0 = arith.constant 0 : i32
    %2 = arith.cmpi ne, %1, %c0_i32_0 : i32
    scf.if %2 {
      %cst_38 = arith.constant -1.000000e+30 : f32
      %55 = vector.broadcast %cst_38 : f32 to vector<2x8x1xf32>
      %c0_39 = arith.constant 0 : index
      %c0_40 = arith.constant 0 : index
      %c0_41 = arith.constant 0 : index
      %56 = vector.load %arg7[%c0_39, %c0_40, %c0_41] : memref<2x8x1xf32, #tpu.memory_space<vmem>>, vector<2x8x1xf32>
      tpu.vector_store %arg7[%c0_39, %c0_40, %c0_41], %55 {strides = array<i32>} : memref<2x8x1xf32, #tpu.memory_space<vmem>>, vector<2x8x1xf32>,
      %cst_42 = arith.constant 0.000000e+00 : f32
      %57 = vector.broadcast %cst_42 : f32 to vector<2x8x1xf32>
      %c0_43 = arith.constant 0 : index
      %c0_44 = arith.constant 0 : index
      %c0_45 = arith.constant 0 : index
      %58 = vector.load %arg8[%c0_43, %c0_44, %c0_45] : memref<2x8x1xf32, #tpu.memory_space<vmem>>, vector<2x8x1xf32>
      tpu.vector_store %arg8[%c0_43, %c0_44, %c0_45], %57 {strides = array<i32>} : memref<2x8x1xf32, #tpu.memory_space<vmem>>, vector<2x8x1xf32>,
      %cst_46 = arith.constant 0.000000e+00 : f32
      %59 = vector.broadcast %cst_46 : f32 to vector<2x8x32xf32>
      %c0_47 = arith.constant 0 : index
      %c0_48 = arith.constant 0 : index
      %c0_49 = arith.constant 0 : index
      %60 = vector.load %arg9[%c0_47, %c0_48, %c0_49] : memref<2x8x32xf32, #tpu.memory_space<vmem>>, vector<2x8x32xf32>
      tpu.vector_store %arg9[%c0_47, %c0_48, %c0_49], %59 {strides = array<i32>} : memref<2x8x32xf32, #tpu.memory_space<vmem>>, vector<2x8x32xf32>,
    } else {
    }
    %c0 = arith.constant 0 : index
    %c0_1 = arith.constant 0 : index
    %c0_2 = arith.constant 0 : index
    %3 = vector.load %arg2[%c0, %c0_1, %c0_2] : memref<2x8x32xf32, #tpu.memory_space<vmem>>, vector<2x8x32xf32>
    %c0_3 = arith.constant 0 : index
    %c0_4 = arith.constant 0 : index
    %c0_5 = arith.constant 0 : index
    %4 = vector.load %arg3[%c0_3, %c0_4, %c0_5] : memref<1x32x4xf32, #tpu.memory_space<vmem>>, vector<1x32x4xf32>
    %5 = vector.shape_cast %4 : vector<1x32x4xf32> to vector<32x4xf32>
    %c0_6 = arith.constant 0 : index
    %c0_7 = arith.constant 0 : index
    %c0_8 = arith.constant 0 : index
    %6 = vector.load %arg4[%c0_6, %c0_7, %c0_8] : memref<1x32x32xf32, #tpu.memory_space<vmem>>, vector<1x32x32xf32>
    %7 = vector.shape_cast %6 : vector<1x32x32xf32> to vector<32x32xf32>
    %c0_9 = arith.constant 0 : index
    %c0_10 = arith.constant 0 : index
    %c0_11 = arith.constant 0 : index
    %8 = vector.load %arg5[%c0_9, %c0_10, %c0_11] : memref<1x1x32xf32, #tpu.memory_space<vmem>>, vector<1x1x32xf32>
    %9 = vector.shape_cast %8 : vector<1x1x32xf32> to vector<1x32xf32>
    %10 = vector.shape_cast %3 : vector<2x8x32xf32> to vector<16x32xf32>
    %cst = arith.constant dense<0.000000e+00> : vector<16x4xf32>
    %11 = tpu.matmul %10, %5, %cst {dimension_numbers = #tpu.dot_dimension_numbers<[1], [0], [0], [1], [0, 0, 1, 1], [], []>} : vector<16x32xf32>, vector<32x4xf32>, vector<16x4xf32> -> vector<16x4xf32>
    %12 = vector.shape_cast %11 : vector<16x4xf32> to vector<2x8x4xf32>
    %13 = tpu.transpose %12, [0, 2, 1] : vector<2x8x4xf32> -> vector<2x4x8xf32>
    %cst_12 = arith.constant dense<0xFF800000> : vector<2x4xf32>
    %14 = vector.multi_reduction <maximumf>, %13, %cst_12 [2] : vector<2x4x8xf32> to vector<2x4xf32>
    %15 = vector.shape_cast %14 : vector<2x4xf32> to vector<2x4x1xf32>
    %16 = vector.broadcast %15 : vector<2x4x1xf32> to vector<2x4x8xf32>
    %17 = arith.subf %13, %16 : vector<2x4x8xf32>
    %18 = math.exp %17 : vector<2x4x8xf32>
    %cst_13 = arith.constant dense<0.000000e+00> : vector<2x4xf32>
    %19 = vector.multi_reduction <add>, %18, %cst_13 [2] : vector<2x4x8xf32> to vector<2x4xf32>
    %20 = vector.shape_cast %19 : vector<2x4xf32> to vector<2x4x1xf32>
    %21 = tpu.reciprocal %20 : vector<2x4x1xf32> -> vector<2x4x1xf32>
    %22 = vector.broadcast %21 : vector<2x4x1xf32> to vector<2x4x8xf32>
    %23 = arith.mulf %18, %22 : vector<2x4x8xf32>
    "tpu.trace_start"() <{level = 10 : i32, message = "bsn,bnd->bsd"}> : () -> ()
    %cst_14 = arith.constant dense<0.000000e+00> : vector<2x4x32xf32>
    %24 = tpu.matmul %23, %3, %cst_14 {dimension_numbers = #tpu.dot_dimension_numbers<[2], [1], [1], [2], [0, 0, 0, 1, 1, 2], [0], [0]>} : vector<2x4x8xf32>, vector<2x8x32xf32>, vector<2x4x32xf32> -> vector<2x4x32xf32>
    "tpu.trace_stop"() : () -> ()
    %25 = vector.shape_cast %24 : vector<2x4x32xf32> to vector<8x32xf32>
    %cst_15 = arith.constant dense<0.000000e+00> : vector<8x32xf32>
    %26 = tpu.matmul %25, %7, %cst_15 {dimension_numbers = #tpu.dot_dimension_numbers<[1], [0], [0], [1], [0, 0, 1, 1], [], []>} : vector<8x32xf32>, vector<32x32xf32>, vector<8x32xf32> -> vector<8x32xf32>
    %27 = vector.broadcast %9 : vector<1x32xf32> to vector<8x32xf32>
    %28 = arith.addf %26, %27 : vector<8x32xf32>
    %29 = vector.shape_cast %28 : vector<8x32xf32> to vector<2x4x32xf32>
    %c0_16 = arith.constant 0 : index
    %c0_17 = arith.constant 0 : index
    %c0_18 = arith.constant 0 : index
    %30 = vector.load %arg7[%c0_16, %c0_17, %c0_18] : memref<2x8x1xf32, #tpu.memory_space<vmem>>, vector<2x8x1xf32>
    %cst_19 = arith.constant dense<0xFF800000> : vector<2x8xf32>
    %31 = vector.multi_reduction <maximumf>, %12, %cst_19 [2] : vector<2x8x4xf32> to vector<2x8xf32>
    %32 = vector.shape_cast %31 : vector<2x8xf32> to vector<2x8x1xf32>
    %33 = arith.maximumf %30, %32 : vector<2x8x1xf32>
    %34 = arith.subf %30, %33 : vector<2x8x1xf32>
    %35 = math.exp %34 : vector<2x8x1xf32>
    %36 = vector.broadcast %33 : vector<2x8x1xf32> to vector<2x8x4xf32>
    %37 = arith.subf %12, %36 : vector<2x8x4xf32>
    %38 = math.exp %37 : vector<2x8x4xf32>
    %c0_20 = arith.constant 0 : index
    %c0_21 = arith.constant 0 : index
    %c0_22 = arith.constant 0 : index
    %39 = vector.load %arg8[%c0_20, %c0_21, %c0_22] : memref<2x8x1xf32, #tpu.memory_space<vmem>>, vector<2x8x1xf32>
    %40 = arith.mulf %35, %39 : vector<2x8x1xf32>
    %cst_23 = arith.constant dense<0.000000e+00> : vector<2x8xf32>
    %41 = vector.multi_reduction <add>, %38, %cst_23 [2] : vector<2x8x4xf32> to vector<2x8xf32>
    %42 = vector.shape_cast %41 : vector<2x8xf32> to vector<2x8x1xf32>
    %43 = arith.addf %40, %42 : vector<2x8x1xf32>
    %c0_24 = arith.constant 0 : index
    %c0_25 = arith.constant 0 : index
    %c0_26 = arith.constant 0 : index
    %44 = vector.load %arg8[%c0_24, %c0_25, %c0_26] : memref<2x8x1xf32, #tpu.memory_space<vmem>>, vector<2x8x1xf32>
    tpu.vector_store %arg8[%c0_24, %c0_25, %c0_26], %43 {strides = array<i32>} : memref<2x8x1xf32, #tpu.memory_space<vmem>>, vector<2x8x1xf32>,
    %c0_27 = arith.constant 0 : index
    %c0_28 = arith.constant 0 : index
    %c0_29 = arith.constant 0 : index
    %45 = vector.load %arg9[%c0_27, %c0_28, %c0_29] : memref<2x8x32xf32, #tpu.memory_space<vmem>>, vector<2x8x32xf32>
    %46 = vector.broadcast %35 : vector<2x8x1xf32> to vector<2x8x32xf32>
    %47 = arith.mulf %46, %45 : vector<2x8x32xf32>
    "tpu.trace_start"() <{level = 10 : i32, message = "bns,bso->bno"}> : () -> ()
    %cst_30 = arith.constant dense<0.000000e+00> : vector<2x8x32xf32>
    %48 = tpu.matmul %38, %29, %cst_30 {dimension_numbers = #tpu.dot_dimension_numbers<[2], [1], [1], [2], [0, 0, 0, 1, 1, 2], [0], [0]>} : vector<2x8x4xf32>, vector<2x4x32xf32>, vector<2x8x32xf32> -> vector<2x8x32xf32>
    "tpu.trace_stop"() : () -> ()
    %49 = arith.addf %47, %48 : vector<2x8x32xf32>
    %c0_31 = arith.constant 0 : index
    %c0_32 = arith.constant 0 : index
    %c0_33 = arith.constant 0 : index
    %50 = vector.load %arg9[%c0_31, %c0_32, %c0_33] : memref<2x8x32xf32, #tpu.memory_space<vmem>>, vector<2x8x32xf32>
    tpu.vector_store %arg9[%c0_31, %c0_32, %c0_33], %49 {strides = array<i32>} : memref<2x8x32xf32, #tpu.memory_space<vmem>>, vector<2x8x32xf32>,
    %c0_34 = arith.constant 0 : index
    %c0_35 = arith.constant 0 : index
    %c0_36 = arith.constant 0 : index
    %51 = vector.load %arg7[%c0_34, %c0_35, %c0_36] : memref<2x8x1xf32, #tpu.memory_space<vmem>>, vector<2x8x1xf32>
    tpu.vector_store %arg7[%c0_34, %c0_35, %c0_36], %33 {strides = array<i32>} : memref<2x8x1xf32, #tpu.memory_space<vmem>>, vector<2x8x1xf32>,
    %c3_i32 = arith.constant 3 : i32
    %52 = arith.cmpi eq, %arg1, %c3_i32 : i32
    %53 = arith.extui %52 : i1 to i32
    %c0_i32_37 = arith.constant 0 : i32
    %54 = arith.cmpi ne, %53, %c0_i32_37 : i32
    scf.if %54 {
      %c0_38 = arith.constant 0 : index
      %c0_39 = arith.constant 0 : index
      %c0_40 = arith.constant 0 : index
      %55 = vector.load %arg9[%c0_38, %c0_39, %c0_40] : memref<2x8x32xf32, #tpu.memory_space<vmem>>, vector<2x8x32xf32>
      %c0_41 = arith.constant 0 : index
      %c0_42 = arith.constant 0 : index
      %c0_43 = arith.constant 0 : index
      %56 = vector.load %arg8[%c0_41, %c0_42, %c0_43] : memref<2x8x1xf32, #tpu.memory_space<vmem>>, vector<2x8x1xf32>
      %57 = tpu.reciprocal %56 : vector<2x8x1xf32> -> vector<2x8x1xf32>
      %58 = vector.broadcast %57 : vector<2x8x1xf32> to vector<2x8x32xf32>
      %59 = arith.mulf %55, %58 : vector<2x8x32xf32>
      %c0_44 = arith.constant 0 : index
      %c0_45 = arith.constant 0 : index
      %c0_46 = arith.constant 0 : index
      %60 = vector.load %arg6[%c0_44, %c0_45, %c0_46] : memref<2x8x32xf32, #tpu.memory_space<vmem>>, vector<2x8x32xf32>
      tpu.vector_store %arg6[%c0_44, %c0_45, %c0_46], %59 {strides = array<i32>} : memref<2x8x32xf32, #tpu.memory_space<vmem>>, vector<2x8x32xf32>,
    } else {
    }
    return
  }
  func.func @transform_0(%arg0: i32, %arg1: i32) -> (i32, i32, i32) {
    %c0_i32 = arith.constant 0 : i32
    %c0_i32_0 = arith.constant 0 : i32
    %c0_i32_1 = arith.constant 0 : i32
    return %arg0, %c0_i32, %c0_i32_0 : i32, i32, i32
  }
  func.func @transform_1(%arg0: i32, %arg1: i32) -> (i32, i32, i32) {
    %c0_i32 = arith.constant 0 : i32
    %c0_i32_0 = arith.constant 0 : i32
    %c0_i32_1 = arith.constant 0 : i32
    return %arg1, %c0_i32, %c0_i32_0 : i32, i32, i32
  }
  func.func @transform_2(%arg0: i32, %arg1: i32) -> (i32, i32, i32) {
    %c0_i32 = arith.constant 0 : i32
    %c0_i32_0 = arith.constant 0 : i32
    %c0_i32_1 = arith.constant 0 : i32
    return %arg1, %c0_i32, %c0_i32_0 : i32, i32, i32
  }
  func.func @transform_3(%arg0: i32, %arg1: i32) -> (i32, i32, i32) {
    %c0_i32 = arith.constant 0 : i32
    %c0_i32_0 = arith.constant 0 : i32
    %c0_i32_1 = arith.constant 0 : i32
    return %arg1, %c0_i32, %c0_i32_0 : i32, i32, i32
  }
  func.func @transform_4(%arg0: i32, %arg1: i32) -> (i32, i32, i32) {
    %c0_i32 = arith.constant 0 : i32
    %c0_i32_0 = arith.constant 0 : i32
    %c0_i32_1 = arith.constant 0 : i32
    return %arg0, %c0_i32, %c0_i32_0 : i32, i32, i32
  }
}

</mosaic_0001>

<bundles_post_ra>
// kernel: tpu_custom_call.1
= control target key start
LH: loop header
LB: loop body
LE: loop exit
PB: predicated region body
PF: predicated region fallthrough
CT: control target
= control target key end

     0   :  { %9 = vsyncpa [#allocation6], 0  ;;  %s1275_s15 = smov 0   ;;  %s1277_s16 = smov 0   ;;  %s1416_s0 = inlined_call_operand.vmem [shape: f32[2,8,32], index: 0, kind: input, shape index: {}]   ;;  %s1417_s1 = inlined_call_operand.vmem [shape: f32[4,32,4], index: 1, kind: input, shape index: {}]   ;;  %s1418_s2 = inlined_call_operand.vmem [shape: f32[4,32,32], index: 2, kind: input, shape index: {}]   ;;  %s1419_s3 = inlined_call_operand.vmem [shape: f32[4,1,32], index: 3, kind: input, shape index: {}]   ;;  %s1420_s4 = inlined_call_operand.hbm [shape: f32[2,8,32], index: 4, kind: output, shape index: {}]  }
   0x1   :  { %s1279_s17 = smov 0  }
   0x2 LB: > { %s1021_s18 = sadd.s32 4294967295, %s1238_s17   ;;  %s24_s19 = sadd.s32 1, %s1234_s16  ;;  %s1238_s17 = sphi %s1279_s17, %s15_s17   ;;  %s1234_s16 = sphi %s1277_s16, %s1423_s16   ;;  %s1230_s15 = sphi %s1275_s15, %s1422_s15  }
   0x3   : > { %p25_p0 = scmp.ge.s32.totalorder %s24_s19, 4  ;;  %p1025_p1 = scmp.ge.s32.totalorder %s1238_s17, 1 }
   0x4   : > { %p204_p2 = scmp.lt.s32.totalorder %s1238_s17, 5 }
   0x5   : > { %s1425_s19 = smov (%p25_p0, %s24_s19), 0 }
   0x6   : > { %p205_p3 = pnand %p1025_p1, %p204_p2 }
   0x7   : > { %p244_p4 = scmp.lt.s32.totalorder (!%p205_p3), %s1230_s15, 3  ;;  %p1030_p5 = scmp.ne.s32.totalorder (!%p205_p3), %s1230_s15, 0 }
   0x8   : > { %208 = sbr.rel (%p205_p3) target bundleno = 1378 (0x562), region = 36 }
   0xf   : > { %s1298_s20 = scalar_select %p244_p4, %s1230_s15, 3 }
  0x10   : > { %261 = sbr.rel (%p1030_p5) target bundleno = 23 (0x17), region = 40  ;;  %vm262_vm0 = vcmask (!%p1030_p5), 7168   ;;  %vm267_vm1 = vcmask (!%p1030_p5), 261120   ;;  %v1240_v0 = vmov (!%p1030_p5), -1e+30   ;;  %v1241_v1 = vmov (!%p1030_p5), 0.0  }
  0x11   : > { %s1046_s21 = sshll.u32 %s1298_s20, 5  ;;  %s256_s24 = scalar_lea.vmem %s1419_s3, %s1298_s20  ;;  %263 = vst.msk [vmem:[#allocation2] sm:$0xff] (!%p1030_p5), %vm262_vm0, %v1240_v0  ;;  %264 = vst.msk [vmem:[#allocation2 + $0x8] sm:$0xff] (!%p1030_p5), %vm262_vm0, %v1240_v0 }
  0x12   : > { %s248_s27 = scalar_lea.vmem %s1417_s1, %s1046_s21  ;;  %s1311_s30 = scalar_lea.vmem %s1418_s2, %s1046_s21  ;;  %265 = vst.msk [vmem:[#allocation3] sm:$0xff] (!%p1030_p5), %vm262_vm0, %v1241_v1  ;;  %266 = vst.msk [vmem:[#allocation3 + $0x8] sm:$0xff] (!%p1030_p5), %vm262_vm0, %v1241_v1 }
  0x13   : > { %268 = vst.msk [vmem:[#allocation4] sm:$0xff] (!%p1030_p5), %vm267_vm1, %v1241_v1  ;;  %269 = vst.msk [vmem:[#allocation4 + $0x8] sm:$0xff] (!%p1030_p5), %vm267_vm1, %v1241_v1 }
  0x17 PF: > { %v272_v2 = vld [vmem:[%s248_s27] sm:$0xff]  ;;  %v273_v3 = vld [vmem:[%s248_s27 + $0x8] sm:$0xff]  ;;  %v274_v4 = vld [vmem:[%s248_s27 + $0x10] sm:$0xff]  ;;  %vm281_vm2 = vcmask 261120   ;;  %vm427_vm3 = vcmask 60416   ;;  %vm682_vm4 = vcmask 31744  }
  0x18   : > { %v1109_v5 = vpack.c.bf16 %v273_v3, %v272_v2  ;;  %v275_v6 = vld [vmem:[%s248_s27 + $0x18] sm:$0xff]  ;;  %v270_v7 = vld [vmem:[%s1416_s0] sm:$0xff]  ;;  %v1321_v9 = vld [vmem:[%s1416_s0 + $0x8] sm:$0xff]  ;;  %v1242_v28 = vmov 0   ;;  %v1243_v29 = vmov 0.0   ;;  %vm1244_vm5 = vmmov 0  }
  0x19   : > { %v1113_v8 = vpack.c.bf16 %v275_v6, %v274_v4  ;;  %1075 = vmatprep.mubr.msk.f32.mxu0 %vm281_vm2, %v270_v7  ;;  %1163 = vset.pattern.permute.xlu1 %v1242_v28  ;;  %v680_v32 = vld [vmem:[#allocation2] sm:$0xff]  ;;  %vm725_vm6 = vcmask 7168   ;;  %v681_v35 = vld [vmem:[#allocation2 + $0x8] sm:$0xff]  ;;  %vm450_vm7 = vcmask 64512   ;;  %v1245_v44 = vmov 0.0|0.0   ;;  %v278_v48 = vld [vmem:[%s1311_s30 + $0x10] sm:$0xff] }
  0x1a   : > { %1110 = vmatprep.subr.bf16.mxu0 %v1109_v5  ;;  %1078 = vmatprep.subr.mxu1 %v1243_v29  ;;  %v276_v45 = vld [vmem:[%s1311_s30] sm:$0xff]  ;;  %v277_v46 = vld [vmem:[%s1311_s30 + $0x8] sm:$0xff]  ;;  %v279_v49 = vld [vmem:[%s1311_s30 + $0x18] sm:$0xff]  ;;  %vm745_vm8 = vcmask 1043456   ;;  %p1041_p6 = scmp.ne.s32.totalorder %s1230_s15, 3 }
  0x1b   : > { %1112 = vmatpush3.bf16.msra.mxu0 %v1109_v5  ;;  %1079 = vmatpush3.msra.mxu1 %v270_v7  ;;  %v1118_v47 = vpack.c.bf16 %v277_v46, %v276_v45  ;;  %v1121_v50 = vpack.c.bf16 %v279_v49, %v278_v48  ;;  %v713_v6 = vld [vmem:[#allocation3] sm:$0xff] }
  0x1c   : > { %1114 = vmatprep.subr.bf16.mxu0 %v1113_v8  ;;  %1080 = vmatprep.mubr.msk.f32.mxu1 %vm1244_vm5, %v1243_v29 }
  0x1d   : > { %1083 = vmatprep.subr.mxu1 %v1243_v29 }
  0x1f   : > { %1116 = vmatpush3.bf16.msra.mxu0 %v1113_v8 }
  0x20   : > { %1099 = vmatprep.subr.mxu0 %v1243_v29 }
  0x22   : > { %1076 = vmatmul.mubr.msk.f32.vlgmr.msra.gmra.mrb[0].mxu0 %vm281_vm2, %v1321_v9 }
  0x23   : > { %1101 = vmatprep.mubr.msk.f32.mxu0 %vm1244_vm5, %v1243_v29 }
  0xf5   : > { %v1325_v10 = vpop.f32.mrb[0].mxu0 }
  0xf6   : > { %v1327_v11 = vpop.f32.mrb[1].mxu0  ;;  %v686_v27 = vsel %vm682_vm4, %v1325_v10, -inf }
  0xf7   : > { %363 = vxpose.xlu0.b32.start.end [1/1] (short) (narrow) %v1327_v11, 8  ;;  %v683_v26 = vsel %vm682_vm4, %v1327_v11, -inf }
  0xfb   : > { %395 = vxpose.xlu0.b32.start.end [1/1] (short) (narrow) %v1325_v10, 8 }
 0x124   : > { %1164 = vset.pattern.permute.xlu0 %v1242_v28 }
 0x177   : > { %v379_v12 = vpop.trf.xlu0 }
 0x178   : > { %v428_v13 = vsel %vm427_vm3, %v379_v12, -inf }
 0x179   : > { %429 = vmax.xlane.f32.xlu1 %v428_v13 }
 0x17b   : > { %v411_v14 = vpop.trf.xlu0 }
 0x17c   : > { %v431_v15 = vsel %vm427_vm3, %v411_v14, -inf }
 0x17d   : > { %432 = vmax.xlane.f32.xlu1 %v431_v15 }
 0x206   : > { %v430_v16 = vpop.xlane.xlu1 %429 }
 0x207   : > { %v434_v17 = vsub.f32 %v379_v12, %v430_v16 }
 0x209   : > { %v436_v18 = vmul.f32 1.442695, %v434_v17 }
 0x20a   : > { %v433_v19 = vpop.xlane.xlu1 %432 }
 0x20b   : > { %1165 = vpow2.f32 %v436_v18  ;;  %v435_v20 = vsub.f32 %v411_v14, %v433_v19  ;;  %v1035_v14 = vld [vmem:[%s256_s24] ss:$0 sm:$0xff] }
 0x20c   : > { %v728_v19 = vld [vmem:[#allocation4] sm:$0xff] }
 0x20d   : > { %v438_v21 = vmul.f32 1.442695, %v435_v20 }
 0x20f   : > { %1167 = vpow2.f32 %v438_v21 }
 0x215   : > { %v1166_v22 = vpop.eup %1165 }
 0x216   : > { %v440_v23 = vsel %vm427_vm3, %v1166_v22, 0.0 }
 0x217   : > { %441 = vadd.xlane.f32.xlu0 %v440_v23 }
 0x219   : > { %v1168_v24 = vpop.eup %1167 }
 0x21a   : > { %v443_v25 = vsel %vm427_vm3, %v1168_v24, 0.0 }
 0x21b   : > { %444 = vadd.xlane.f32.xlu1 %v443_v25 }
 0x21f   : > { %684 = vmax.xlane.f32.xlu1 %v683_v26 }
 0x223   : > { %687 = vmax.xlane.f32.xlu1 %v686_v27 }
 0x2a4   : > { %v442_v30 = vpop.xlane.xlu0 %441 }
 0x2a5   : > { %1169 = vrcp.f32 %v442_v30 }
 0x2a8   : > { %v445_v31 = vpop.xlane.xlu1 %444 }
 0x2a9   : > { %1171 = vrcp.f32 %v445_v31 }
 0x2ac   : > { %v685_v33 = vpop.xlane.xlu1 %684 }
 0x2ad   : > { %v689_v34 = vmax.f32 %v680_v32, %v685_v33  ;;  %v1246_v33 = vmov (!%p1041_p6), 0  }
 0x2af   : > { %v1170_v36 = vpop.eup %1169  ;;  %v691_v37 = vsub.f32 %v680_v32, %v689_v34  ;;  %897 = vst.msk [vmem:[#allocation2] sm:$0xff] %vm725_vm6, %v689_v34  ;;  %699 = vperm.xlu1 %1163, %v689_v34  }
 0x2b0   : > { %v688_v38 = vpop.xlane.xlu1 %687  ;;  %v448_v39 = vmul.f32 %v1170_v36, %v1166_v22  ;;  %v729_v22 = vld [vmem:[#allocation4 + $0x8] sm:$0xff] }
 0x2b1   : > { %v690_v40 = vmax.f32 %v681_v35, %v688_v38  ;;  %v693_v62 = vmul.f32 1.442695, %v691_v37 }
 0x2b2   : > { %1081 = vmatmul.mubr.msk.f32.vlgmr.msra.gmra.mrb[0].mxu1 %vm450_vm7, %v448_v39 }
 0x2b3   : > { %v1172_v41 = vpop.eup %1171  ;;  %v692_v42 = vsub.f32 %v681_v35, %v690_v40  ;;  %898 = vst.msk [vmem:[#allocation2 + $0x8] sm:$0xff] %vm725_vm6, %v690_v40  ;;  %704 = vperm.xlu1 %1163, %v690_v40   ;;  %1084 = vmatpush3.msra.mxu1 %v1321_v9  ;;  %v714_v9 = vld [vmem:[#allocation3 + $0x8] sm:$0xff] }
 0x2b4   : > { %v449_v43 = vmul.f32 %v1172_v41, %v1168_v24  ;;  %1085 = vmatprep.mubr.msk.f32.mxu1 %vm1244_vm5, %v1243_v29  ;;  %1117 = vmatprep.subr.bf16.mxu1 %v1245_v44 }
 0x2b5   : > { %v695_v60 = vmul.f32 1.442695, %v692_v42 }
 0x2b6   : > { %1086 = vmatmul.mubr.msk.f32.vlgmr.msra.gmra.mrb[2].mxu1 %vm450_vm7, %v449_v43 }
 0x2b7   : > { %1096 = vmatprep.mubr.msk.f32.mxu1 %vm1244_vm5, %v1243_v29  ;;  %1119 = vmatpush3.bf16.msra.mxu1 %v1118_v47 }
 0x2b8   : > { %1120 = vmatprep.subr.bf16.mxu1 %v1245_v44 }
 0x2bb   : > { %1122 = vmatpush3.bf16.msra.mxu1 %v1121_v50 }
 0x32e   : > { %v700_v51 = vpop.permute.xlu1 %699 }
 0x32f   : > { %v707_v52 = vsub.f32 %v1327_v11, %v700_v51 }
 0x331   : > { %v709_v53 = vmul.f32 1.442695, %v707_v52 }
 0x332   : > { %v705_v54 = vpop.permute.xlu1 %704 }
 0x333   : > { %1173 = vpow2.f32 %v709_v53  ;;  %v708_v55 = vsub.f32 %v1325_v10, %v705_v54 }
 0x335   : > { %v711_v56 = vmul.f32 1.442695, %v708_v55 }
 0x337   : > { %1175 = vpow2.f32 %v711_v56 }
 0x338   : > { %1177 = vpow2.f32 %v695_v60 }
 0x339   : > { %1179 = vpow2.f32 %v693_v62 }
 0x33d   : > { %v1174_v57 = vpop.eup %1173 }
 0x33e   : > { %v717_v58 = vsel %vm682_vm4, %v1174_v57, 0.0 }
 0x33f   : > { %718 = vadd.xlane.f32.xlu1 %v717_v58 }
 0x341   : > { %v1176_v59 = vpop.eup %1175 }
 0x342   : > { %v720_v61 = vsel %vm682_vm4, %v1176_v59, 0.0  ;;  %v1178_v63 = vpop.eup %1177 }
 0x343   : > { %721 = vadd.xlane.f32.xlu0 %v720_v61  ;;  %v1180_v0 = vpop.eup %1179  ;;  %v716_v11 = vmul.f32 %v1178_v63, %v714_v9 }
 0x344   : > { %v715_v7 = vmul.f32 %v1180_v0, %v713_v6 }
 0x350   : > { %737 = vperm.xlu1 %1163, %v1178_v63  }
 0x359   : > { %732 = vperm.xlu0 %1164, %v1180_v0  }
 0x35d   : > { %1181 = vset.pattern.permute.xlu0 (!%p1041_p6), %v1246_v33 }
 0x385   : > { %v520_v1 = vpop.f32.mrb[0].mxu1 }
 0x386   : > { %v1082_v2 = vpop.f32.mrb[1].mxu1 }
 0x389   : > { %v593_v3 = vpop.f32.mrb[2].mxu1 }
 0x38a   : > { %v605_v4 = vcombine.low %v520_v1, %v593_v3  ;;  %v1087_v5 = vpop.f32.mrb[3].mxu1 }
 0x38c   : > { %1097 = vmatmul.mubr.msk.f32.vlgmr.msra.gmra.mrb[4].mxu1 %vm281_vm2, %v605_v4 }
 0x3cc   : > { %v719_v8 = vpop.xlane.xlu1 %718 }
 0x3cd   : > { %v723_v10 = vadd.f32 %v719_v8, %v715_v7 }
 0x3cf   : > { %726 = vst.msk [vmem:[#allocation3] sm:$0xff] %vm725_vm6, %v723_v10 }
 0x3d0   : > { %v722_v12 = vpop.xlane.xlu0 %721  ;;  %v738_v23 = vpop.permute.xlu1 %737 }
 0x3d1   : > { %v724_v13 = vadd.f32 %v722_v12, %v716_v11  ;;  %v741_v27 = vmul.f32 %v738_v23, %v729_v22 }
 0x3d3   : > { %727 = vst.msk [vmem:[#allocation3 + $0x8] sm:$0xff] %vm725_vm6, %v724_v13 }
 0x3d8   : > { %v733_v20 = vpop.permute.xlu0 %732 }
 0x3d9   : > { %v740_v21 = vmul.f32 %v733_v20, %v728_v19 }
 0x3da   : > { %v906_v32 = vld [vmem:[#allocation3 + $0x8] sm:$0xff] (!%p1041_p6) }
 0x45f   : > { %v674_v15 = vpop.f32.mrb[4].mxu1 }
 0x460   : > { %v675_v16 = vadd.f32 %v1035_v14, %v674_v15  ;;  %v1098_v17 = vpop.f32.mrb[5].mxu1 }
 0x462   : > { %v679_v18 = vcombine.high %v675_v16, %v675_v16  ;;  %1100 = vmatpush3.msk.msra.mxu0 %vm745_vm8, %v675_v16 }
 0x463   : > { %1102 = vmatmul.mubr.msk.f32.vlgmr.msra.gmra.mrb[2].mxu0 %vm682_vm4, %v1174_v57  ;;  %1104 = vmatprep.subr.mxu0 %v1243_v29 }
 0x464   : > { %1105 = vmatpush3.msk.msra.mxu0 %vm745_vm8, %v679_v18  ;;  %1106 = vmatprep.mubr.msk.f32.mxu0 %vm1244_vm5, %v1243_v29  ;;  %v905_v29 = vld [vmem:[#allocation3] sm:$0xff] (!%p1041_p6) }
 0x465   : > { %1182 = vrcp.f32 (!%p1041_p6), %v905_v29 }
 0x466   : > { %1184 = vrcp.f32 (!%p1041_p6), %v906_v32 }
 0x467   : > { %1107 = vmatmul.mubr.msk.f32.vlgmr.msra.gmra.mrb[4].mxu0 %vm682_vm4, %v1176_v59 }
 0x46f   : > { %v1183_v34 = vpop.eup (!%p1041_p6), %1182 }
 0x470   : > { %911 = vperm.xlu0 (!%p1041_p6), %1181, %v1183_v34   ;;  %v1185_v35 = vpop.eup (!%p1041_p6), %1184 }
 0x474   : > { %916 = vperm.xlu0 (!%p1041_p6), %1181, %v1185_v35  }
 0x4ef   : > { %v912_v37 = vpop.permute.xlu0 (!%p1041_p6), %911 }
 0x4f3   : > { %v917_v40 = vpop.permute.xlu0 (!%p1041_p6), %916 }
 0x536   : > { %v814_v24 = vpop.f32.mrb[2].mxu0 }
 0x537   : > { %v893_v25 = vadd.f32 %v814_v24, %v740_v21  ;;  %v1103_v26 = vpop.f32.mrb[3].mxu0  ;;  %902 = sbr.rel (%p1041_p6) target bundleno = 1352 (0x548), region = 44 }
 0x539   : > { %895 = vst.msk [vmem:[#allocation4] sm:$0xff] %vm281_vm2, %v893_v25 }
 0x53a   : > { %v889_v28 = vpop.f32.mrb[4].mxu0 }
 0x53b   : > { %v894_v30 = vadd.f32 %v889_v28, %v741_v27  ;;  %v1108_v31 = vpop.f32.mrb[5].mxu0 }
 0x53d   : > { %896 = vst.msk [vmem:[#allocation4 + $0x8] sm:$0xff] %vm281_vm2, %v894_v30 }
 0x540   : > { %v903_v36 = vld [vmem:[#allocation4] sm:$0xff] }
 0x541   : > { %v919_v38 = vmul.f32 %v912_v37, %v903_v36 }
 0x543   : > { %921 = vst.msk [vmem:[#allocation5] sm:$0xff] %vm281_vm2, %v919_v38 }
 0x544   : > { %v904_v39 = vld [vmem:[#allocation4 + $0x8] sm:$0xff] }
 0x545   : > { %v920_v41 = vmul.f32 %v917_v40, %v904_v39 }
 0x547   : > { %922 = vst.msk [vmem:[#allocation5 + $0x8] sm:$0xff] %vm281_vm2, %v920_v41 }
 0x548 PF: > { %p1381_p7 = scmp.eq.s32.totalorder %s1021_s18, 3  ;;  %s1247_s12 = smov [#allocation5]  }
 0x549   : > { %s932_s13 = sshll.u32 %s1247_s12, 4  ;;  %s933_s13 = int_to_ptr.vmem [resolvable:$true] %s932_s13 }
 0x54a   : > { %s1186_s14 = scalar_lea.vmem %s933_s13, 256  ;;  %p1193_p11 = scmp.lt.s32.totalorder %s933_s13, %s933_s13 }
 0x54b   : > { %p1187_p8 = scmp.ne.s32.totalorder %s933_s13, %s1186_s14  ;;  %p1194_p12 = scmp.lt.s32.totalorder %s1186_s14, %s1186_s14 }
 0x54d   : > { %p1188_p9 = pnand %p1187_p8, %p1381_p7  ;;  %p1195_p13 = por %p1194_p12, %p1193_p11 }
 0x54f   : > { %p1189_p10 = pneg %p1188_p9 }
 0x551   : > { %p1196_p0 = pnand %p1195_p13, %p1189_p10 }
 0x553   : > { %1199 = shalt.err (!%p1196_p0)
}
 0x554   : > { %s1200_s18 = scalar_lea.hbm %s1420_s4, 256 }
 0x555   : > { %p1201_p1 = scmp.ne.s32.totalorder %s1420_s4, %s1200_s18  ;;  %p1206_p4 = scmp.lt.u32.totalorder %s1200_s18, %s1420_s4 }
 0x557   : > { %p1202_p2 = pnand %p1201_p1, %p1381_p7 }
 0x559   : > { %p1203_p3 = pneg %p1202_p2 }
 0x55b   : > { %p1208_p5 = pnand %p1206_p4, %p1203_p3 }
 0x55d   : > { %1211 = shalt.err (!%p1208_p5)
}
 0x55e   : > { %s1248_s25 = smov 128   ;;  %s1249_s26 = smov 8  }
 0x55f   : > { %1124 = dma.vmem_to_hbm [thread:$0]  (%p1381_p7), %s933_s13, 256, %s1420_s4, [#allocation6], %s1248_s25, %s1248_s25, %s1249_s26  }
 0x560   : > { %1225 = dma.done.wait (%p1381_p7), [#allocation6], 256  }
 0x561   : > { %1227 = vsyncadd (%p1381_p7), [#allocation6], 4294967040 }
 0x562 PF: > { %s15_s17 = sadd.s32 1, %s1238_s17   ;;  %s1422_s15 = smov %s1234_s16 }
 0x563   : > { %p12_p6 = scmp.ge.s32.totalorder %s15_s17, 6   ;;  %s1423_s16 = smov %s1425_s19 }
 0x565   :  { %14 = sbr.rel (!%p12_p6) target bundleno = 2 (0x2), region = 81 }
 0x56c   :  { %948 = vsyncpa [#allocation6], 1 }
 0x56d   :  { %950 = vsyncpa [#allocation6 + $0x1], 1 }

</bundles_post_ra>
